<compile_context>
chip_gen: v6e
topology: v6e:2x2x1
jax: 0.10.0
libtpu: 0.0.40
codegen_flags: <defaults>
</compile_context>

<pallas_src>
import functools

import jax
import jax.numpy as jnp
from jax.experimental import pallas as pl
from jax.experimental.pallas import tpu as pltpu

LANE = 128


def _round_up(x, m):
    return ((x + m - 1) // m) * m


def _cdiv(a, b):
    return -(-a // b)


def _pad2d(a, shape):
    return jnp.pad(a, ((0, shape[0] - a.shape[0]), (0, shape[1] - a.shape[1])))


def actor_kernel(x_ref, w1_ref, b1_ref, w2_ref, b2_ref, w4_ref, b4_ref, o_ref):
    # bf16 matmul operands (x cast in-kernel), fp32 accumulation / bias / acts.
    x = x_ref[...].astype(jnp.bfloat16)                              # (TB, S)
    h1 = jnp.dot(x, w1_ref[...], preferred_element_type=jnp.float32) + b1_ref[...]
    h1 = jnp.maximum(h1, 0.0)
    h2 = jnp.dot(h1.astype(jnp.bfloat16), w2_ref[...],
                 preferred_element_type=jnp.float32) + b2_ref[...]
    h2 = jnp.maximum(h2, 0.0)
    out = jnp.dot(h2.astype(jnp.bfloat16), w4_ref[...],
                  preferred_element_type=jnp.float32) + b4_ref[...]
    # fp32 tanh (v5e has no bf16 EUP), bf16 lane-dense store (half writeback).
    o_ref[...] = jnp.tanh(out).astype(o_ref.dtype)


def prepare_actor_params(w1, b1, w2, b2, w4, b4):
    """One-time pad-to-128-lanes + bf16 weight cast.

    Call once after (re)initializing/updating parameters, NOT per forward call.
    Returns (padded_params_tuple, n_actions).
    """
    n_states, hidden = w1.shape
    n_actions = w4.shape[1]
    Hp = _round_up(hidden, LANE)
    Np = _round_up(n_actions, LANE)

    w1p = _pad2d(w1, (n_states, Hp)).astype(jnp.bfloat16)
    b1p = _pad2d(b1, (1, Hp)).astype(jnp.float32)
    w2p = _pad2d(w2, (Hp, Hp)).astype(jnp.bfloat16)
    b2p = _pad2d(b2, (1, Hp)).astype(jnp.float32)
    w4p = _pad2d(w4, (Hp, Np)).astype(jnp.bfloat16)
    b4p = _pad2d(b4, (1, Np)).astype(jnp.float32)
    return (w1p, b1p, w2p, b2p, w4p, b4p), n_actions


@functools.partial(jax.jit, static_argnames=("n_actions", "block_batch"))
def actor_forward(x, w1p, b1p, w2p, b2p, w4p, b4p, *, n_actions, block_batch=256):
    """Fused Actor forward. Expects params pre-padded by prepare_actor_params."""
    batch, n_states = x.shape
    Hp = w1p.shape[1]
    Np = w4p.shape[1]

    # --- batch tiling -------------------------------------------------------
    # Round to 16 rows (bf16 sublane packing of h/out tiles); guarantee >= 2
    # grid steps when batch >= 32 so v7x's two TensorCores both get work.
    b16 = _round_up(batch, 16)
    if b16 >= 32:
        TB = min(block_batch, _round_up(_cdiv(b16, 2), 16))
    else:
        TB = b16
    Bp = _round_up(batch, TB)
    grid = (Bp // TB,)

    # Only pad x when the batch isn't already tile-aligned (no per-call cast).
    x_in = x if Bp == batch else jnp.pad(x, ((0, Bp - batch), (0, 0)))

    # --- cost / VMEM budget -------------------------------------------------
    flops = 2 * Bp * (n_states * Hp + Hp * Hp + Hp * Np)
    bytes_accessed = (
        Bp * n_states * 4                              # x (fp32)
        + (n_states * Hp + Hp * Hp + Hp * Np) * 2      # weights (bf16)
        + (2 * Hp + Np) * 4                            # biases (fp32)
        + Bp * Np * 2                                  # output (bf16)
    )
    cost = pl.CostEstimate(flops=flops, transcendentals=Bp * Np,
                           bytes_accessed=bytes_accessed)

    weight_bytes = (n_states * Hp + Hp * Hp + Hp * Np) * 2 + (2 * Hp + Np) * 4
    stream_bytes = TB * n_states * 4 + TB * Np * 2          # x tile + out tile
    interm_bytes = 2 * TB * Hp * 4 + TB * Np * 4            # h1, h2, out (fp32)
    budget = 2 * (weight_bytes + stream_bytes) + interm_bytes  # 2x: double buffers
    vmem_limit = int(min(max(2 * budget + (8 << 20), 16 << 20), 64 << 20))

    const = lambda i: (0, 0)   # weights/biases: same block every step (VMEM-resident)

    out_padded = pl.pallas_call(
        actor_kernel,
        out_shape=jax.ShapeDtypeStruct((Bp, Np), jnp.bfloat16),
        grid=grid,
        in_specs=[
            pl.BlockSpec((TB, n_states), lambda i: (i, 0)),   # x tile streams
            pl.BlockSpec((n_states, Hp), const),
            pl.BlockSpec((1, Hp), const),
            pl.BlockSpec((Hp, Hp), const),
            pl.BlockSpec((1, Hp), const),
            pl.BlockSpec((Hp, Np), const),
            pl.BlockSpec((1, Np), const),
        ],
        out_specs=pl.BlockSpec((TB, Np), lambda i: (i, 0)),   # lane-dense output tile
        compiler_params=pltpu.CompilerParams(
            dimension_semantics=("parallel",),                # 2 TCs split the batch
            vmem_limit_bytes=vmem_limit),
        cost_estimate=cost,
    )(x_in, w1p, b1p, w2p, b2p, w4p, b4p)

    return out_padded[:batch, :n_actions].astype(jnp.float32)


def init_actor_params(key, n_states, n_actions, hidden_dim_1, init_w=0.0001):
    """Deterministic init mirroring the PyTorch module's shapes.

    linear1/linear2: uniform(-1/sqrt(fan_in), 1/sqrt(fan_in))  (PyTorch default)
    linear4:         uniform(-init_w, init_w)
    Weights are returned as (in, out) == transpose of PyTorch's (out, in).
    Biases are (1, out) for TPU-friendly 2D broadcasting.
    """
    k1, k2, k3, k4, k5, k6 = jax.random.split(key, 6)

    bound1 = 1.0 / jnp.sqrt(jnp.float32(n_states))
    w1 = jax.random.uniform(k1, (n_states, hidden_dim_1), jnp.float32, -bound1, bound1)
    b1 = jax.random.uniform(k2, (1, hidden_dim_1), jnp.float32, -bound1, bound1)

    bound2 = 1.0 / jnp.sqrt(jnp.float32(hidden_dim_1))
    w2 = jax.random.uniform(k3, (hidden_dim_1, hidden_dim_1), jnp.float32, -bound2, bound2)
    b2 = jax.random.uniform(k4, (1, hidden_dim_1), jnp.float32, -bound2, bound2)

    w4 = jax.random.uniform(k5, (hidden_dim_1, n_actions), jnp.float32, -init_w, init_w)
    b4 = jax.random.uniform(k6, (1, n_actions), jnp.float32, -init_w, init_w)

    return w1, b1, w2, b2, w4, b4


def reference_forward_f32(x, w1, b1, w2, b2, w4, b4):
    h1 = jnp.maximum(x @ w1 + b1, 0.0)
    h2 = jnp.maximum(h1 @ w2 + b2, 0.0)
    return jnp.tanh(h2 @ w4 + b4)


def reference_forward_bf16(x, w1, b1, w2, b2, w4, b4):
    # Mirrors the kernel's bf16-operand / fp32-accumulate math + bf16 output.
    xb = x.astype(jnp.bfloat16)
    w1b, w2b, w4b = (w.astype(jnp.bfloat16) for w in (w1, w2, w4))
    h1 = jnp.maximum(jnp.dot(xb, w1b, preferred_element_type=jnp.float32) + b1, 0.0)
    h2 = jnp.maximum(jnp.dot(h1.astype(jnp.bfloat16), w2b,
                             preferred_element_type=jnp.float32) + b2, 0.0)
    y = jnp.tanh(jnp.dot(h2.astype(jnp.bfloat16), w4b,
                         preferred_element_type=jnp.float32) + b4)
    return y.astype(jnp.bfloat16).astype(jnp.float32)


if __name__ == "__main__":
    n_states, n_actions, hidden_dim_1 = 16, 4, 32
    batch = 32   # tile-aligned; produces a 2-step "parallel" grid

    key = jax.random.PRNGKey(0)
    kx, kp = jax.random.split(key)
    x = jax.random.normal(kx, (batch, n_states), jnp.float32)
    raw_params = init_actor_params(kp, n_states, n_actions, hidden_dim_1)

    # One-time parameter prep (pad + bf16 cast) outside the per-call forward.
    padded_params, n_act = prepare_actor_params(*raw_params)

    out = actor_forward(x, *padded_params, n_actions=n_act)
    jax.block_until_ready(out)
    assert out.shape == (batch, n_actions)
    assert out.dtype == jnp.float32

    # Tight check against a reference using the same bf16 math (incl. output cast).
    ref_bf16 = reference_forward_bf16(x, *raw_params)
    assert jnp.allclose(out, ref_bf16, atol=5e-4, rtol=1e-2), "bf16-ref mismatch"

    # Loose check against the pure fp32 reference (bf16 operands lose mantissa).
    ref_f32 = reference_forward_f32(x, *raw_params)
    assert jnp.allclose(out, ref_f32, atol=2e-2, rtol=2e-2), "f32-ref mismatch"

    print("KERNEL_OK")
</pallas_src>

<mosaic_0001>
module attributes {stable_mosaic.version = 11 : i64} {
  func.func @actor_kernel(%arg0: i32, %arg1: memref<16x16xf32, #tpu.memory_space<vmem>>, %arg2: memref<16x128xbf16, #tpu.memory_space<vmem>>, %arg3: memref<1x128xf32, #tpu.memory_space<vmem>>, %arg4: memref<128x128xbf16, #tpu.memory_space<vmem>>, %arg5: memref<1x128xf32, #tpu.memory_space<vmem>>, %arg6: memref<128x128xbf16, #tpu.memory_space<vmem>>, %arg7: memref<1x128xf32, #tpu.memory_space<vmem>>, %arg8: memref<16x128xbf16, #tpu.memory_space<vmem>>) attributes {dimension_semantics = [#tpu.dimension_semantics<parallel>], iteration_bounds = array<i64: 2>, scalar_prefetch = 0 : i64, scratch_operands = 0 : i64, tpu.core_type = #tpu.core_type<tc>, window_params = [{transform_indices = @transform_0, window_bounds = array<i64: 16, 16>}, {pipeline_mode = #tpu.pipeline_mode<synchronous>, transform_indices = @transform_1, window_bounds = array<i64: 16, 128>}, {pipeline_mode = #tpu.pipeline_mode<synchronous>, transform_indices = @transform_2, window_bounds = array<i64: 1, 128>}, {pipeline_mode = #tpu.pipeline_mode<synchronous>, transform_indices = @transform_3, window_bounds = array<i64: 128, 128>}, {pipeline_mode = #tpu.pipeline_mode<synchronous>, transform_indices = @transform_4, window_bounds = array<i64: 1, 128>}, {pipeline_mode = #tpu.pipeline_mode<synchronous>, transform_indices = @transform_5, window_bounds = array<i64: 128, 128>}, {pipeline_mode = #tpu.pipeline_mode<synchronous>, transform_indices = @transform_6, window_bounds = array<i64: 1, 128>}, {transform_indices = @transform_7, window_bounds = array<i64: 16, 128>}]} {
    %c0 = arith.constant 0 : index
    %c0_0 = arith.constant 0 : index
    %0 = vector.load %arg1[%c0, %c0_0] : memref<16x16xf32, #tpu.memory_space<vmem>>, vector<16x16xf32>
    %1 = arith.truncf %0 : vector<16x16xf32> to vector<16x16xbf16>
    %c0_1 = arith.constant 0 : index
    %c0_2 = arith.constant 0 : index
    %2 = vector.load %arg2[%c0_1, %c0_2] : memref<16x128xbf16, #tpu.memory_space<vmem>>, vector<16x128xbf16>
    %cst = arith.constant dense<0.000000e+00> : vector<16x128xf32>
    %3 = tpu.matmul %1, %2, %cst {dimension_numbers = #tpu.dot_dimension_numbers<[1], [0], [0], [1], [0, 0, 1, 1], [], []>} : vector<16x16xbf16>, vector<16x128xbf16>, vector<16x128xf32> -> vector<16x128xf32>
    %c0_3 = arith.constant 0 : index
    %c0_4 = arith.constant 0 : index
    %4 = vector.load %arg3[%c0_3, %c0_4] : memref<1x128xf32, #tpu.memory_space<vmem>>, vector<1x128xf32>
    %5 = vector.broadcast %4 : vector<1x128xf32> to vector<16x128xf32>
    %6 = arith.addf %3, %5 : vector<16x128xf32>
    %cst_5 = arith.constant 0.000000e+00 : f32
    %7 = vector.broadcast %cst_5 : f32 to vector<16x128xf32>
    %8 = arith.maximumf %6, %7 : vector<16x128xf32>
    %9 = arith.truncf %8 : vector<16x128xf32> to vector<16x128xbf16>
    %c0_6 = arith.constant 0 : index
    %c0_7 = arith.constant 0 : index
    %10 = vector.load %arg4[%c0_6, %c0_7] : memref<128x128xbf16, #tpu.memory_space<vmem>>, vector<128x128xbf16>
    %cst_8 = arith.constant dense<0.000000e+00> : vector<16x128xf32>
    %11 = tpu.matmul %9, %10, %cst_8 {dimension_numbers = #tpu.dot_dimension_numbers<[1], [0], [0], [1], [0, 0, 1, 1], [], []>} : vector<16x128xbf16>, vector<128x128xbf16>, vector<16x128xf32> -> vector<16x128xf32>
    %c0_9 = arith.constant 0 : index
    %c0_10 = arith.constant 0 : index
    %12 = vector.load %arg5[%c0_9, %c0_10] : memref<1x128xf32, #tpu.memory_space<vmem>>, vector<1x128xf32>
    %13 = vector.broadcast %12 : vector<1x128xf32> to vector<16x128xf32>
    %14 = arith.addf %11, %13 : vector<16x128xf32>
    %cst_11 = arith.constant 0.000000e+00 : f32
    %15 = vector.broadcast %cst_11 : f32 to vector<16x128xf32>
    %16 = arith.maximumf %14, %15 : vector<16x128xf32>
    %17 = arith.truncf %16 : vector<16x128xf32> to vector<16x128xbf16>
    %c0_12 = arith.constant 0 : index
    %c0_13 = arith.constant 0 : index
    %18 = vector.load %arg6[%c0_12, %c0_13] : memref<128x128xbf16, #tpu.memory_space<vmem>>, vector<128x128xbf16>
    %cst_14 = arith.constant dense<0.000000e+00> : vector<16x128xf32>
    %19 = tpu.matmul %17, %18, %cst_14 {dimension_numbers = #tpu.dot_dimension_numbers<[1], [0], [0], [1], [0, 0, 1, 1], [], []>} : vector<16x128xbf16>, vector<128x128xbf16>, vector<16x128xf32> -> vector<16x128xf32>
    %c0_15 = arith.constant 0 : index
    %c0_16 = arith.constant 0 : index
    %20 = vector.load %arg7[%c0_15, %c0_16] : memref<1x128xf32, #tpu.memory_space<vmem>>, vector<1x128xf32>
    %21 = vector.broadcast %20 : vector<1x128xf32> to vector<16x128xf32>
    %22 = arith.addf %19, %21 : vector<16x128xf32>
    %23 = math.tanh %22 : vector<16x128xf32>
    %24 = arith.truncf %23 : vector<16x128xf32> to vector<16x128xbf16>
    %c0_17 = arith.constant 0 : index
    %c0_18 = arith.constant 0 : index
    %25 = vector.load %arg8[%c0_17, %c0_18] : memref<16x128xbf16, #tpu.memory_space<vmem>>, vector<16x128xbf16>
    tpu.vector_store %arg8[%c0_17, %c0_18], %24 {strides = array<i32>} : memref<16x128xbf16, #tpu.memory_space<vmem>>, vector<16x128xbf16>,
    return
  }
  func.func @transform_0(%arg0: i32) -> (i32, i32) {
    %c0_i32 = arith.constant 0 : i32
    %c0_i32_0 = arith.constant 0 : i32
    return %arg0, %c0_i32 : i32, i32
  }
  func.func @transform_1(%arg0: i32) -> (i32, i32) {
    %c0_i32 = arith.constant 0 : i32
    %c0_i32_0 = arith.constant 0 : i32
    %c0_i32_1 = arith.constant 0 : i32
    return %c0_i32, %c0_i32_0 : i32, i32
  }
  func.func @transform_2(%arg0: i32) -> (i32, i32) {
    %c0_i32 = arith.constant 0 : i32
    %c0_i32_0 = arith.constant 0 : i32
    %c0_i32_1 = arith.constant 0 : i32
    return %c0_i32, %c0_i32_0 : i32, i32
  }
  func.func @transform_3(%arg0: i32) -> (i32, i32) {
    %c0_i32 = arith.constant 0 : i32
    %c0_i32_0 = arith.constant 0 : i32
    %c0_i32_1 = arith.constant 0 : i32
    return %c0_i32, %c0_i32_0 : i32, i32
  }
  func.func @transform_4(%arg0: i32) -> (i32, i32) {
    %c0_i32 = arith.constant 0 : i32
    %c0_i32_0 = arith.constant 0 : i32
    %c0_i32_1 = arith.constant 0 : i32
    return %c0_i32, %c0_i32_0 : i32, i32
  }
  func.func @transform_5(%arg0: i32) -> (i32, i32) {
    %c0_i32 = arith.constant 0 : i32
    %c0_i32_0 = arith.constant 0 : i32
    %c0_i32_1 = arith.constant 0 : i32
    return %c0_i32, %c0_i32_0 : i32, i32
  }
  func.func @transform_6(%arg0: i32) -> (i32, i32) {
    %c0_i32 = arith.constant 0 : i32
    %c0_i32_0 = arith.constant 0 : i32
    %c0_i32_1 = arith.constant 0 : i32
    return %c0_i32, %c0_i32_0 : i32, i32
  }
  func.func @transform_7(%arg0: i32) -> (i32, i32) {
    %c0_i32 = arith.constant 0 : i32
    %c0_i32_0 = arith.constant 0 : i32
    return %arg0, %c0_i32 : i32, i32
  }
}

</mosaic_0001>

<bundles_post_ra>
// kernel: actor_forward.1
= control target key start
LH: loop header
LB: loop body
LE: loop exit
PB: predicated region body
PF: predicated region fallthrough
CT: control target
= control target key end

     0   :  { %12 = vsyncpa [#allocation3], 0  ;;  %s1079_s0 = inlined_call_operand.vmem [shape: f32[32,16], index: 0, kind: input, shape index: {}]   ;;  %s1080_s1 = inlined_call_operand.vmem [shape: bf16[16,128], index: 1, kind: input, shape index: {}]   ;;  %s1081_s2 = inlined_call_operand.vmem [shape: f32[1,128], index: 2, kind: input, shape index: {}]   ;;  %s1082_s3 = inlined_call_operand.hbm [shape: bf16[128,128], index: 3, kind: input, shape index: {}]   ;;  %s1083_s4 = inlined_call_operand.vmem [shape: f32[1,128], index: 4, kind: input, shape index: {}]   ;;  %s1084_s5 = inlined_call_operand.hbm [shape: bf16[128,128], index: 5, kind: input, shape index: {}]   ;;  %s1085_s6 = inlined_call_operand.vmem [shape: f32[1,128], index: 6, kind: input, shape index: {}]   ;;  %s1086_s7 = inlined_call_operand.vmem [shape: bf16[32,128], index: 7, kind: output, shape index: {}]  }
   0x1   :  { %13 = vsyncpa [#allocation5], 0  ;;  %s975_s24 = smov 0  }
   0x2 LB: > { %s696_s25 = sadd.s32 4294967295, %s927_s24   ;;  %p698_p0 = scmp.ge.s32.totalorder %s927_s24, 1  ;;  %s927_s24 = sphi %s975_s24, %s19_s24  }
   0x3   : > { %p202_p1 = scmp.lt.s32.totalorder %s927_s24, 3  ;;  %s929_s26 = smov [#allocation2]  }
   0x4   : > { %s220_s27 = sshll.u32 %s929_s26, 4  ;;  %p989_p3 = scmp.eq.s32.totalorder %s696_s25, 0  ;;  %s221_s27 = int_to_ptr.vmem [resolvable:$true] %s220_s27 }
   0x5   : > { %p983_p2 = pnand %p698_p0, %p202_p1  ;;  %s930_s30 = smov [#allocation4]  }
   0x6   : > { %s236_s8 = sshll.u32 %s930_s30, 4  ;;  %s872_s10 = scalar_lea.vmem %s221_s27, 1024  ;;  %s237_s8 = int_to_ptr.vmem [resolvable:$true] %s236_s8 }
   0x7   : > { %p815_p4 = pneg %p983_p2  ;;  %p873_p7 = scmp.ne.s32.totalorder %s221_s27, %s872_s10 }
   0x8   : > { %p880_p10 = scmp.lt.s32.totalorder %s221_s27, %s221_s27  ;;  %p881_p11 = scmp.lt.s32.totalorder %s872_s10, %s872_s10 }
   0x9   : > { %p997_p5 = pnand %p989_p3, %p815_p4 }
   0xa   : > { %p882_p12 = por %p881_p11, %p880_p10 }
   0xb   : > { %p863_p6 = pneg %p997_p5 }
   0xd   : > { %p875_p8 = pnand %p873_p7, %p863_p6 }
   0xf   : > { %p876_p9 = pneg %p875_p8 }
  0x11   : > { %p883_p13 = pnand %p882_p12, %p876_p9 }
  0x13   : > { %886 = shalt.err (!%p883_p13)
}
  0x14   : > { %s931_s11 = smov 64   ;;  %s932_s12 = smov 4  }
  0x15   : > { %818 = dma.hbm_to_vmem [thread:$0]  (!%p997_p5), %s1082_s3, 1024, %s221_s27, [#allocation3], %s931_s11, %s931_s11, %s932_s12  }
  0x16   : > { %s898_s15 = scalar_lea.vmem %s237_s8, 1024  ;;  %p906_p7 = scmp.lt.s32.totalorder %s237_s8, %s237_s8 }
  0x17   : > { %p899_p0 = scmp.ne.s32.totalorder %s237_s8, %s898_s15  ;;  %p907_p8 = scmp.lt.s32.totalorder %s898_s15, %s898_s15 }
  0x19   : > { %p901_p1 = pnand %p899_p0, %p863_p6  ;;  %p908_p10 = por %p907_p8, %p906_p7 }
  0x1b   : > { %p902_p4 = pneg %p901_p1 }
  0x1d   : > { %p909_p9 = pnand %p908_p10, %p902_p4 }
  0x1f   : > { %912 = shalt.err (!%p909_p9)
}
  0x20   : > { %821 = dma.hbm_to_vmem [thread:$0]  (!%p997_p5), %s1084_s5, 1024, %s237_s8, [#allocation5], %s931_s11, %s931_s11, %s932_s12  }
  0x21   : > { %264 = sbr.rel (%p983_p2) target bundleno = 672 (0x2a0), region = 48 }
  0x26   : > { %918 = dma.done.wait (%p989_p3), [#allocation3], 1024  }
  0x27   : > { %920 = vsyncadd (%p989_p3), [#allocation3], 4294966272 }
  0x28   : > { %922 = dma.done.wait (%p989_p3), [#allocation5], 1024  }
  0x29   : > { %924 = vsyncadd (%p989_p3), [#allocation5], 4294966272  ;;  %s705_s18 = sshll.u32 %s696_s25, 1  ;;  %v933_v0 = vmov 0.0   ;;  %vm934_vm0 = vmmov 0   ;;  %v840_v1 = vld [vmem:[%s1080_s1] sm:$0xff]  }
  0x2a   : > { %761 = vmatprep.subr.bf16.mxu0 %v933_v0  ;;  %763 = vmatprep.mubr.msk.bf16.mxu0 %vm934_vm0, %v933_v0  ;;  %p301_p2 = scmp.lt.s32.totalorder %s705_s18, 3  ;;  %vm331_vm1 = vcmask 130048   ;;  %v841_v5 = vld [vmem:[#allocation2 + $0x38] sm:$0xff]   ;;  %v842_v6 = vld [vmem:[#allocation2 + $0x30] sm:$0xff]   ;;  %v843_v7 = vld [vmem:[#allocation2 + $0x28] sm:$0xff]  }
  0x2b   : > { %767 = vmatprep.subr.bf16.mxu1 %v933_v0  ;;  %783 = vmatprep.mubr.msk.bf16.mxu1 %vm934_vm0, %v933_v0  ;;  %v844_v8 = vld [vmem:[#allocation2 + $0x20] sm:$0xff]   ;;  %v845_v9 = vld [vmem:[#allocation2 + $0x18] sm:$0xff]   ;;  %v846_v10 = vld [vmem:[#allocation2 + $0x10] sm:$0xff]  }
  0x2c   : > { %s1091_s18 = smov (!%p301_p2, %s705_s18), 3  ;;  %762 = vmatpush3.bf16.msra.mxu0 %v840_v1  ;;  %768 = vmatpush3.bf16.msra.mxu1 %v841_v5  ;;  %v847_v11 = vld [vmem:[#allocation2 + $0x8] sm:$0xff]   ;;  %v848_v12 = vld [vmem:[#allocation2] sm:$0xff]   ;;  %v849_v13 = vld [vmem:[#allocation4 + $0x38] sm:$0xff]  }
  0x2d   : > { %s706_s19 = sshll.u32 %s1091_s18, 3  ;;  %787 = vmatprep.subr.bf16.mxu0 %v933_v0  ;;  %769 = vmatprep.subr.bf16.mxu1 %v933_v0  ;;  %v850_v14 = vld [vmem:[#allocation4 + $0x30] sm:$0xff]   ;;  %v851_v15 = vld [vmem:[#allocation4 + $0x28] sm:$0xff]   ;;  %v852_v16 = vld [vmem:[#allocation4 + $0x20] sm:$0xff]   ;;  %s708_s9 = sshll.u32 %s1091_s18, 2 }
  0x2e   : > { %s304_s22 = scalar_lea.vmem %s1079_s0, %s706_s19  ;;  %v853_v17 = vld [vmem:[#allocation4 + $0x18] sm:$0xff]   ;;  %v709_v18 = vld [vmem:[%s1081_s2] ss:$0 sm:$0xff]  ;;  %v854_v28 = vld [vmem:[#allocation4 + $0x10] sm:$0xff]   ;;  %s310_s12 = scalar_lea.vmem %s1086_s7, %s708_s9 }
  0x2f   : > { %v313_v2 = vld [vmem:[%s304_s22] sm:$0xff]  ;;  %v314_v3 = vld [vmem:[%s304_s22 + $0x8] sm:$0xff] }
  0x30   : > { %v315_v4 = vpack.c.bf16 %v314_v3, %v313_v2  ;;  %770 = vmatpush3.bf16.msra.mxu1 %v842_v6  ;;  %v855_v29 = vld [vmem:[#allocation4 + $0x8] sm:$0xff]   ;;  %v856_v30 = vld [vmem:[#allocation4] sm:$0xff]  }
  0x31   : > { %771 = vmatprep.subr.bf16.mxu1 %v933_v0  ;;  %v712_v31 = vld [vmem:[%s1083_s4] ss:$0 sm:$0xff] }
  0x32   : > { %764 = vmatmul.mubr.msk.bf16.vlgmr.msra.gmra.mxu0 %vm331_vm1, %v315_v4  ;;  %v721_v41 = vld [vmem:[%s1085_s6] ss:$0 sm:$0xff] }
  0x33   : > { %803 = vmatprep.mubr.msk.bf16.mxu0 %vm934_vm0, %v933_v0  ;;  %788 = vmatpush3.bf16.msra.mxu0 %v849_v13 }
  0x34   : > { %772 = vmatpush3.bf16.msra.mxu1 %v843_v7  ;;  %789 = vmatprep.subr.bf16.mxu0 %v933_v0 }
  0x35   : > { %773 = vmatprep.subr.bf16.mxu1 %v933_v0 }
  0x37   : > { %790 = vmatpush3.bf16.msra.mxu0 %v850_v14 }
  0x38   : > { %774 = vmatpush3.bf16.msra.mxu1 %v844_v8  ;;  %791 = vmatprep.subr.bf16.mxu0 %v933_v0 }
  0x39   : > { %775 = vmatprep.subr.bf16.mxu1 %v933_v0 }
  0x3b   : > { %792 = vmatpush3.bf16.msra.mxu0 %v851_v15 }
  0x3c   : > { %776 = vmatpush3.bf16.msra.mxu1 %v845_v9  ;;  %793 = vmatprep.subr.bf16.mxu0 %v933_v0 }
  0x3d   : > { %777 = vmatprep.subr.bf16.mxu1 %v933_v0 }
  0x3f   : > { %794 = vmatpush3.bf16.msra.mxu0 %v852_v16 }
  0x40   : > { %778 = vmatpush3.bf16.msra.mxu1 %v846_v10  ;;  %795 = vmatprep.subr.bf16.mxu0 %v933_v0 }
  0x41   : > { %779 = vmatprep.subr.bf16.mxu1 %v933_v0 }
  0x43   : > { %796 = vmatpush3.bf16.msra.mxu0 %v853_v17 }
  0x44   : > { %780 = vmatpush3.bf16.msra.mxu1 %v847_v11  ;;  %797 = vmatprep.subr.bf16.mxu0 %v933_v0 }
  0x45   : > { %781 = vmatprep.subr.bf16.mxu1 %v933_v0 }
  0x47   : > { %798 = vmatpush3.bf16.msra.mxu0 %v854_v28 }
  0x48   : > { %782 = vmatpush3.bf16.msra.mxu1 %v848_v12  ;;  %799 = vmatprep.subr.bf16.mxu0 %v933_v0 }
  0x4b   : > { %800 = vmatpush3.bf16.msra.mxu0 %v855_v29 }
  0x4c   : > { %801 = vmatprep.subr.bf16.mxu0 %v933_v0 }
  0x4f   : > { %802 = vmatpush3.bf16.msra.mxu0 %v856_v30 }
  0xf2   : > { %v369_v19 = vpop.f32.mrf.mxu0 }
  0xf3   : > { %v370_v21 = vadd.f32 %v709_v18, %v369_v19 }
  0xf4   : > { %v765_v20 = vpop.f32.mrf.mxu0 }
  0xf5   : > { %v376_v25 = vmax.f32 %v370_v21, 0.0 }
  0xf6   : > { %v372_v22 = vpop.f32.mrf.mxu0 }
  0xf7   : > { %v373_v23 = vadd.f32 %v709_v18, %v372_v22 }
  0xf8   : > { %v766_v24 = vpop.f32.mrf.mxu0 }
  0xf9   : > { %v377_v26 = vmax.f32 %v373_v23, 0.0 }
  0xfb   : > { %v378_v27 = vpack.c.bf16 %v377_v26, %v376_v25 }
  0xfd   : > { %784 = vmatmul.mubr.bf16.vlgmr.msra.gmra.mxu1 %v378_v27 }
 0x1bd   : > { %v484_v32 = vpop.f32.mrf.mxu1 }
 0x1be   : > { %v485_v34 = vadd.f32 %v712_v31, %v484_v32 }
 0x1bf   : > { %v785_v33 = vpop.f32.mrf.mxu1 }
 0x1c0   : > { %v491_v38 = vmax.f32 %v485_v34, 0.0 }
 0x1c1   : > { %v487_v35 = vpop.f32.mrf.mxu1 }
 0x1c2   : > { %v488_v36 = vadd.f32 %v712_v31, %v487_v35 }
 0x1c3   : > { %v786_v37 = vpop.f32.mrf.mxu1 }
 0x1c4   : > { %v492_v39 = vmax.f32 %v488_v36, 0.0 }
 0x1c6   : > { %v493_v40 = vpack.c.bf16 %v492_v39, %v491_v38 }
 0x1c8   : > { %804 = vmatmul.mubr.bf16.vlgmr.msra.gmra.mxu0 %v493_v40 }
 0x288   : > { %v599_v42 = vpop.f32.mrf.mxu0 }
 0x289   : > { %v600_v43 = vadd.f32 %v721_v41, %v599_v42 }
 0x28a   : > { %v805_v44 = vpop.f32.mrf.mxu0 }
 0x28b   : > { %857 = vtanh.f32 %v600_v43 }
 0x28c   : > { %v602_v45 = vpop.f32.mrf.mxu0 }
 0x28d   : > { %v603_v46 = vadd.f32 %v721_v41, %v602_v45 }
 0x28e   : > { %v806_v47 = vpop.f32.mrf.mxu0 }
 0x28f   : > { %859 = vtanh.f32 %v603_v46 }
 0x298   : > { %v858_v48 = vpop.eup %857 }
 0x29c   : > { %v860_v49 = vpop.eup %859 }
 0x29d   : > { %v739_v50 = vpack.c.bf16 %v860_v49, %v858_v48 }
 0x29f   : > { %740 = vst [vmem:[%s310_s12] sm:$0xff] %v739_v50  }
 0x2a0 PF: > { %s19_s24 = sadd.s32 1, %s927_s24  }
 0x2a1   : > { %p16_p3 = scmp.ge.s32.totalorder %s19_s24, 4  }
 0x2a3   :  { %18 = sbr.rel (!%p16_p3) target bundleno = 2 (0x2), region = 87 }
 0x2a8   :  { %640 = vsyncpa [#allocation3], 1 }
 0x2a9   :  { %642 = vsyncpa [#allocation3 + $0x1], 1 }
 0x2aa   :  { %643 = vsyncpa [#allocation5], 1 }

</bundles_post_ra>
